<compile_context>
chip_gen: v7x
topology: tpu7x:2x2x1
jax: 0.10.0
libtpu: 0.0.40
codegen_flags: <defaults>
</compile_context>

<pallas_src>
import functools

import jax
import jax.numpy as jnp
from jax import lax
from jax.experimental import pallas as pl
from jax.experimental.pallas import tpu as pltpu

# Large finite negative used for masking (avoids exp(-inf - (-inf)) = NaN).
_MASK_VALUE = -0.7 * float(jnp.finfo(jnp.float32).max)


def _sdpa_kernel(q_ref, k_ref, v_ref, o_ref, qs_ref, m_ref, l_ref, acc_ref,
                 *, scale, use_mask, diagnol, tq, tk, mask_value,
                 compute_dtype):
    # Block shapes (batch dim squeezed out by pl.Squeezed()):
    #   q_ref: (tq, Dp), k_ref: (tk, Dp), v_ref: (tk, Dvp), o_ref: (tq, Dvp)
    qi = pl.program_id(1)
    ki = pl.program_id(2)
    nk = pl.num_programs(2)

    @pl.when(ki == 0)
    def _init():
        # Fold the softmax scale into Q once per q tile and stage it in the
        # MXU compute dtype; reused across all kv steps.
        qs_ref[...] = (q_ref[...].astype(jnp.float32) * scale).astype(compute_dtype)
        m_ref[...] = jnp.full_like(m_ref, -jnp.inf)
        l_ref[...] = jnp.zeros_like(l_ref)
        acc_ref[...] = jnp.zeros_like(acc_ref)

    def _step(apply_mask):
        q = qs_ref[...]                                   # (tq, Dp) compute dtype
        k = k_ref[...].astype(compute_dtype)              # (tk, Dp)
        # Transpose-free QK^T: contract the feature dim of both operands.
        s = lax.dot_general(
            q, k, (((1,), (1,)), ((), ())),
            preferred_element_type=jnp.float32)           # (tq, tk), f32

        if apply_mask:
            row = lax.broadcasted_iota(jnp.int32, (tq, tk), 0) + qi * tq
            col = lax.broadcasted_iota(jnp.int32, (tq, tk), 1) + ki * tk
            # torch.triu(-inf*ones, diagnol): mask where col - row >= diagnol.
            masked = (col - row) >= diagnol
            s = jnp.where(masked, mask_value, s)

        m_prev = m_ref[...]
        m_cur = jnp.maximum(m_prev, jnp.max(s, axis=-1, keepdims=True))
        alpha = jnp.exp(m_prev - m_cur)
        p = jnp.exp(s - m_cur)
        if apply_mask:
            # Exact masking: even if every column of this tile is masked for
            # some row (possible when diagnol <= 0), the masked probabilities
            # are exactly zero.
            p = jnp.where(masked, 0.0, p)
        l_ref[...] = alpha * l_ref[...] + jnp.sum(p, axis=-1, keepdims=True)
        acc_ref[...] = alpha * acc_ref[...] + jnp.dot(
            p.astype(compute_dtype), v_ref[...].astype(compute_dtype),
            preferred_element_type=jnp.float32)
        m_ref[...] = m_cur

    if use_mask:
        q_start = qi * tq
        k_start = ki * tk
        # Tile-level classification (scalar int math, free on the scalar unit).
        fully_masked = (k_start - (q_start + tq - 1)) >= diagnol
        fully_visible = ((k_start + tk - 1) - q_start) < diagnol

        # Diagonal-crossing tiles: build the iota mask.
        @pl.when(jnp.logical_and(jnp.logical_not(fully_masked),
                                 jnp.logical_not(fully_visible)))
        def _crossing():
            _step(apply_mask=True)

        # Fully visible tiles: no mask VPU work at all.
        @pl.when(fully_visible)
        def _visible():
            _step(apply_mask=False)
        # Fully masked tiles: compute skipped here, and their HBM->VMEM DMA is
        # suppressed by the clamped K/V index_map in the wrapper.
    else:
        _step(apply_mask=False)

    @pl.when(ki == nk - 1)
    def _finalize():
        l = l_ref[...]
        # EUP approximate reciprocal + 2 Newton-Raphson refinements on a
        # (tq, 1) column (full f32 accuracy, off the VALU critical path).
        # Fully-masked rows (l == 0) produce NaN, matching the PyTorch ref.
        inv = pl.reciprocal(l, approx=True)
        inv = inv * (2.0 - l * inv)
        inv = inv * (2.0 - l * inv)
        o_ref[...] = (acc_ref[...] * inv).astype(o_ref.dtype)


def _tpu_generation():
    try:
        kind = jax.devices()[0].device_kind.lower()
    except Exception:
        return 6
    for g in (7, 6, 5, 4, 3):
        if str(g) in kind:
            return g
    return 6


def _physical_vmem_bytes():
    try:
        return int(pltpu.get_tpu_info().vmem_capacity_bytes)
    except Exception:
        return 64 << 20   # conservative (v7x has 64 MiB per TensorCore)


def _pick_tile(s, cap, alignments):
    """Largest tile <= cap dividing s, preferring the given alignments."""
    if s <= cap:
        return s
    for align in alignments:
        start = cap - (cap % align)
        for t in range(start, 0, -align):
            if s % t == 0:
                return t
    # TODO(synk): pad S (and mask the tail) instead of failing for awkward S.
    raise ValueError(
        f"sequence length {s} has no tile <= {cap} aligned to {alignments}; "
        "pad the sequence length or pass q_tile/kv_tile explicitly.")


def _pad_last_to_multiple(x, multiple=128):
    d = x.shape[-1]
    pad = (-d) % multiple
    if pad == 0:
        return x
    return jnp.pad(x, ((0, 0), (0, 0), (0, pad)))


def scaled_dot_product_attention(Q, K, V, *, d_k, mask=False, diagnol=1,
                                 q_tile=None, kv_tile=None,
                                 compute_dtype=jnp.bfloat16,
                                 kv_buffering=None):
    """Pallas equivalent of ScaledDotProductAttention.forward."""
    assert Q.ndim == 3 and K.shape == Q.shape and V.shape[:2] == Q.shape[:2]
    B, S, D = Q.shape
    Dv = V.shape[2]
    out_dtype = Q.dtype
    scale = 1.0 / (float(d_k) ** 0.5)
    compute_dtype = jnp.dtype(compute_dtype)

    # Lane-dense feature dims: zero-pad D/Dv up to multiples of 128 (zero
    # columns do not change QK^T; padded output columns are sliced off).
    Qp = _pad_last_to_multiple(Q)
    Kp = _pad_last_to_multiple(K)
    Vp = _pad_last_to_multiple(V)
    Dp, Dvp = Qp.shape[-1], Vp.shape[-1]

    gen = _tpu_generation()
    if gen >= 6:
        # 2x256 MXU: wide tk (256-aligned preferred), moderate tq.
        tq_cap, tk_cap, aligns = 256, 512, (256, 128, 8)
    else:
        # v5e and older: 4x128 MXU, single vst slot -> smaller tiles.
        tq_cap, tk_cap, aligns = 256, 256, (128, 8)

    tq = q_tile if q_tile is not None else _pick_tile(S, tq_cap, aligns)
    tk = kv_tile if kv_tile is not None else _pick_tile(S, tk_cap, aligns)
    assert S % tq == 0 and S % tk == 0
    nq, nk = S // tq, S // tk

    kernel = functools.partial(
        _sdpa_kernel, scale=scale, use_mask=bool(mask), diagnol=int(diagnol),
        tq=tq, tk=tk, mask_value=_MASK_VALUE, compute_dtype=compute_dtype)

    if mask:
        # Causal DMA clamp: fully-masked kv tiles reuse the last visible kv
        # block index, so their HBM->VMEM DMA is suppressed (compute for those
        # steps is skipped inside the kernel with pl.when).
        def kv_index_map(b, qi, ki, _tq=tq, _tk=tk, _dg=int(diagnol)):
            num = qi * _tq + (_tq + _dg - 2)        # last visible col for this q tile
            last = jnp.maximum(num, 0) // _tk       # last non-fully-masked kv block
            return (b, jnp.minimum(ki, last), 0)
    else:
        def kv_index_map(b, qi, ki):
            return (b, ki, 0)

    # Optional deeper K/V buffering (useful on 128 MiB VMEM parts, v5e/v6e).
    kv_kwargs = {}
    if kv_buffering is not None and kv_buffering != 2:
        kv_kwargs = dict(pipeline_mode=pl.Buffered(int(kv_buffering)))
    kv_bufs = int(kv_buffering) if kv_buffering is not None else 2

    # VMEM budget from the actual tile footprint (with headroom), clamped to
    # 3/4 of the physical VMEM of this part (honest on v7x's 64 MiB).
    in_isz = Q.dtype.itemsize
    resident = (2 * tq * Dp * in_isz                         # Q (dbl-buffered)
                + kv_bufs * tk * (Dp + Dvp) * in_isz         # K, V buffers
                + 2 * tq * Dvp * out_dtype.itemsize          # output (dbl-buffered)
                + tq * Dp * compute_dtype.itemsize           # scaled-Q scratch
                + (2 * tq + tq * Dvp) * 4                    # m, l, acc scratch
                + 2 * tq * tk * 4)                           # s / p temporaries
    vmem_ceiling = (_physical_vmem_bytes() * 3) // 4
    vmem_limit = int(min(max(2 * resident + (8 << 20), 32 << 20), vmem_ceiling))

    # Advisory cost estimate for the XLA scheduler.
    causal_factor = (0.5 * (1.0 + 1.0 / max(nk, 1))) if mask else 1.0
    cost = pl.CostEstimate(
        flops=int(2 * B * S * S * (Dp + Dvp) * causal_factor),
        transcendentals=int(B * S * S * causal_factor),
        bytes_accessed=int(in_isz * B * S *
                           (Dp + (Dp + Dvp) * nq * causal_factor + Dvp)),
    )

    grid_spec = pltpu.PrefetchScalarGridSpec(
        num_scalar_prefetch=0,
        grid=(B, nq, nk),
        in_specs=[
            pl.BlockSpec((pl.Squeezed(), tq, Dp), lambda b, qi, ki: (b, qi, 0)),
            pl.BlockSpec((pl.Squeezed(), tk, Dp), kv_index_map, **kv_kwargs),
            pl.BlockSpec((pl.Squeezed(), tk, Dvp), kv_index_map, **kv_kwargs),
        ],
        out_specs=pl.BlockSpec((pl.Squeezed(), tq, Dvp),
                               lambda b, qi, ki: (b, qi, 0)),
        scratch_shapes=[
            pltpu.VMEM((tq, Dp), compute_dtype),   # scaled Q tile
            pltpu.VMEM((tq, 1), jnp.float32),      # running max
            pltpu.VMEM((tq, 1), jnp.float32),      # running denominator
            pltpu.VMEM((tq, Dvp), jnp.float32),    # output accumulator
        ],
    )

    out = pl.pallas_call(
        kernel,
        out_shape=jax.ShapeDtypeStruct((B, S, Dvp), out_dtype),
        grid_spec=grid_spec,
        compiler_params=pltpu.CompilerParams(
            dimension_semantics=("parallel", "parallel", "arbitrary"),
            vmem_limit_bytes=vmem_limit,
        ),
        cost_estimate=cost,
    )(Qp, Kp, Vp)

    if Dvp != Dv:
        out = out[..., :Dv]
    return out


def _reference(Q, K, V, *, d_k, mask=False, diagnol=1):
    sim = jnp.einsum("bqd,bkd->bqk", Q.astype(jnp.float32),
                     K.astype(jnp.float32)) / (float(d_k) ** 0.5)
    if mask:
        s = Q.shape[1]
        row = lax.broadcasted_iota(jnp.int32, (s, s), 0)
        col = lax.broadcasted_iota(jnp.int32, (s, s), 1)
        sim = jnp.where(col - row >= diagnol, -jnp.inf, sim)
    w = jax.nn.softmax(sim, axis=-1)
    return jnp.einsum("bqk,bkd->bqd", w, V.astype(jnp.float32))


def _bf16_reference(Q, K, V, **kw):
    cast = lambda x: x.astype(jnp.bfloat16).astype(jnp.float32)
    return _reference(cast(Q), cast(K), cast(V), **kw)


if __name__ == "__main__":
    # Small deterministic shapes consistent with the module: (B=2, S=8, d_k=32).
    B, S, D = 2, 8, 32
    key = jax.random.PRNGKey(0)
    kq, kk, kv = jax.random.split(key, 3)
    Q = jax.random.normal(kq, (B, S, D), dtype=jnp.float32)
    K = jax.random.normal(kk, (B, S, D), dtype=jnp.float32)
    V = jax.random.normal(kv, (B, S, D), dtype=jnp.float32)

    # Exact (f32-MXU) path: validates the flash-attention logic bit-tightly.
    out_f32 = jax.block_until_ready(scaled_dot_product_attention(
        Q, K, V, d_k=D, mask=False, compute_dtype=jnp.float32))
    assert jnp.allclose(out_f32, _reference(Q, K, V, d_k=D, mask=False),
                        atol=1e-5, rtol=1e-5)

    out_f32_m = jax.block_until_ready(scaled_dot_product_attention(
        Q, K, V, d_k=D, mask=True, diagnol=1, compute_dtype=jnp.float32))
    assert jnp.allclose(out_f32_m,
                        _reference(Q, K, V, d_k=D, mask=True, diagnol=1),
                        atol=1e-5, rtol=1e-5)

    # Default fast path (bf16 MXU operands, f32 accumulation).
    out_bf = jax.block_until_ready(
        scaled_dot_product_attention(Q, K, V, d_k=D, mask=False))
    assert jnp.allclose(out_bf, _bf16_reference(Q, K, V, d_k=D, mask=False),
                        atol=3e-2, rtol=3e-2)

    # Multi-tile path: exercises online softmax across kv tiles, the crossing /
    # fully-visible mask branches, and the causal K/V DMA clamp.
    S2 = 256
    kq2, kk2, kv2 = jax.random.split(jax.random.PRNGKey(0), 3)
    Q2 = jax.random.normal(kq2, (B, S2, D), dtype=jnp.float32)
    K2 = jax.random.normal(kk2, (B, S2, D), dtype=jnp.float32)
    V2 = jax.random.normal(kv2, (B, S2, D), dtype=jnp.float32)

    out2_f32 = jax.block_until_ready(scaled_dot_product_attention(
        Q2, K2, V2, d_k=D, mask=True, diagnol=1, q_tile=128, kv_tile=128,
        compute_dtype=jnp.float32))
    assert jnp.allclose(out2_f32,
                        _reference(Q2, K2, V2, d_k=D, mask=True, diagnol=1),
                        atol=1e-4, rtol=1e-4)

    out2_bf = jax.block_until_ready(scaled_dot_product_attention(
        Q2, K2, V2, d_k=D, mask=True, diagnol=1, q_tile=128, kv_tile=128))
    assert jnp.allclose(out2_bf,
                        _bf16_reference(Q2, K2, V2, d_k=D, mask=True, diagnol=1),
                        atol=3e-2, rtol=3e-2)

    out2u_bf = jax.block_until_ready(scaled_dot_product_attention(
        Q2, K2, V2, d_k=D, mask=False, q_tile=128, kv_tile=128))
    assert jnp.allclose(out2u_bf, _bf16_reference(Q2, K2, V2, d_k=D, mask=False),
                        atol=3e-2, rtol=3e-2)

    print("KERNEL_OK")
</pallas_src>

<mosaic_0001>
module attributes {stable_mosaic.version = 11 : i64} {
  func.func @_sdpa_kernel(%arg0: i32, %arg1: i32, %arg2: i32, %arg3: memref<1x8x128xf32, #tpu.memory_space<vmem>>, %arg4: memref<1x8x128xf32, #tpu.memory_space<vmem>>, %arg5: memref<1x8x128xf32, #tpu.memory_space<vmem>>, %arg6: memref<1x8x128xf32, #tpu.memory_space<vmem>>, %arg7: memref<8x128xf32, #tpu.memory_space<vmem>>, %arg8: memref<8x1xf32, #tpu.memory_space<vmem>>, %arg9: memref<8x1xf32, #tpu.memory_space<vmem>>, %arg10: memref<8x128xf32, #tpu.memory_space<vmem>>) attributes {dimension_semantics = [#tpu.dimension_semantics<parallel>, #tpu.dimension_semantics<parallel>, #tpu.dimension_semantics<arbitrary>], iteration_bounds = array<i64: 2, 1, 1>, scalar_prefetch = 0 : i64, scratch_operands = 4 : i64, tpu.core_type = #tpu.core_type<tc>, window_params = [{transform_indices = @transform_0, window_bounds = array<i64: 1, 8, 128>}, {transform_indices = @transform_1, window_bounds = array<i64: 1, 8, 128>}, {transform_indices = @transform_2, window_bounds = array<i64: 1, 8, 128>}, {transform_indices = @transform_3, window_bounds = array<i64: 1, 8, 128>}]} {
    %c0_i32 = arith.constant 0 : i32
    %0 = arith.cmpi eq, %arg2, %c0_i32 : i32
    %1 = arith.extui %0 : i1 to i32
    %c0_i32_0 = arith.constant 0 : i32
    %2 = arith.cmpi ne, %1, %c0_i32_0 : i32
    scf.if %2 {
      %c0_25 = arith.constant 0 : index
      %c0_26 = arith.constant 0 : index
      %c0_27 = arith.constant 0 : index
      %34 = vector.load %arg3[%c0_25, %c0_26, %c0_27] : memref<1x8x128xf32, #tpu.memory_space<vmem>>, vector<1x8x128xf32>
      %35 = vector.shape_cast %34 : vector<1x8x128xf32> to vector<8x128xf32>
      %cst_28 = arith.constant 0.176776692 : f32
      %36 = vector.broadcast %cst_28 : f32 to vector<8x128xf32>
      %37 = arith.mulf %35, %36 : vector<8x128xf32>
      %c0_29 = arith.constant 0 : index
      %c0_30 = arith.constant 0 : index
      %38 = vector.load %arg7[%c0_29, %c0_30] : memref<8x128xf32, #tpu.memory_space<vmem>>, vector<8x128xf32>
      tpu.vector_store %arg7[%c0_29, %c0_30], %37 {strides = array<i32>} : memref<8x128xf32, #tpu.memory_space<vmem>>, vector<8x128xf32>,
      %cst_31 = arith.constant 0xFF800000 : f32
      %39 = vector.broadcast %cst_31 : f32 to vector<8x1xf32>
      %c0_32 = arith.constant 0 : index
      %c0_33 = arith.constant 0 : index
      %40 = vector.load %arg8[%c0_32, %c0_33] : memref<8x1xf32, #tpu.memory_space<vmem>>, vector<8x1xf32>
      tpu.vector_store %arg8[%c0_32, %c0_33], %39 {strides = array<i32>} : memref<8x1xf32, #tpu.memory_space<vmem>>, vector<8x1xf32>,
      %cst_34 = arith.constant 0.000000e+00 : f32
      %41 = vector.broadcast %cst_34 : f32 to vector<8x1xf32>
      %c0_35 = arith.constant 0 : index
      %c0_36 = arith.constant 0 : index
      %42 = vector.load %arg9[%c0_35, %c0_36] : memref<8x1xf32, #tpu.memory_space<vmem>>, vector<8x1xf32>
      tpu.vector_store %arg9[%c0_35, %c0_36], %41 {strides = array<i32>} : memref<8x1xf32, #tpu.memory_space<vmem>>, vector<8x1xf32>,
      %cst_37 = arith.constant 0.000000e+00 : f32
      %43 = vector.broadcast %cst_37 : f32 to vector<8x128xf32>
      %c0_38 = arith.constant 0 : index
      %c0_39 = arith.constant 0 : index
      %44 = vector.load %arg10[%c0_38, %c0_39] : memref<8x128xf32, #tpu.memory_space<vmem>>, vector<8x128xf32>
      tpu.vector_store %arg10[%c0_38, %c0_39], %43 {strides = array<i32>} : memref<8x128xf32, #tpu.memory_space<vmem>>, vector<8x128xf32>,
    } else {
    }
    %c0 = arith.constant 0 : index
    %c0_1 = arith.constant 0 : index
    %3 = vector.load %arg7[%c0, %c0_1] : memref<8x128xf32, #tpu.memory_space<vmem>>, vector<8x128xf32>
    %c0_2 = arith.constant 0 : index
    %c0_3 = arith.constant 0 : index
    %c0_4 = arith.constant 0 : index
    %4 = vector.load %arg4[%c0_2, %c0_3, %c0_4] : memref<1x8x128xf32, #tpu.memory_space<vmem>>, vector<1x8x128xf32>
    %5 = vector.shape_cast %4 : vector<1x8x128xf32> to vector<8x128xf32>
    %cst = arith.constant dense<0.000000e+00> : vector<8x8xf32>
    %6 = tpu.matmul %3, %5, %cst {dimension_numbers = #tpu.dot_dimension_numbers<[1], [1], [0], [0], [0, 0, 1, 0], [], []>} : vector<8x128xf32>, vector<8x128xf32>, vector<8x8xf32> -> vector<8x8xf32>
    %c0_5 = arith.constant 0 : index
    %c0_6 = arith.constant 0 : index
    %7 = vector.load %arg8[%c0_5, %c0_6] : memref<8x1xf32, #tpu.memory_space<vmem>>, vector<8x1xf32>
    %cst_7 = arith.constant dense<0xFF800000> : vector<8xf32>
    %8 = vector.multi_reduction <maximumf>, %6, %cst_7 [1] : vector<8x8xf32> to vector<8xf32>
    %9 = vector.shape_cast %8 : vector<8xf32> to vector<8x1xf32>
    %10 = arith.maximumf %7, %9 : vector<8x1xf32>
    %11 = arith.subf %7, %10 : vector<8x1xf32>
    %12 = math.exp %11 : vector<8x1xf32>
    %13 = vector.broadcast %10 : vector<8x1xf32> to vector<8x8xf32>
    %14 = arith.subf %6, %13 : vector<8x8xf32>
    %15 = math.exp %14 : vector<8x8xf32>
    %c0_8 = arith.constant 0 : index
    %c0_9 = arith.constant 0 : index
    %16 = vector.load %arg9[%c0_8, %c0_9] : memref<8x1xf32, #tpu.memory_space<vmem>>, vector<8x1xf32>
    %17 = arith.mulf %12, %16 : vector<8x1xf32>
    %cst_10 = arith.constant dense<0.000000e+00> : vector<8xf32>
    %18 = vector.multi_reduction <add>, %15, %cst_10 [1] : vector<8x8xf32> to vector<8xf32>
    %19 = vector.shape_cast %18 : vector<8xf32> to vector<8x1xf32>
    %20 = arith.addf %17, %19 : vector<8x1xf32>
    %c0_11 = arith.constant 0 : index
    %c0_12 = arith.constant 0 : index
    %21 = vector.load %arg9[%c0_11, %c0_12] : memref<8x1xf32, #tpu.memory_space<vmem>>, vector<8x1xf32>
    tpu.vector_store %arg9[%c0_11, %c0_12], %20 {strides = array<i32>} : memref<8x1xf32, #tpu.memory_space<vmem>>, vector<8x1xf32>,
    %c0_13 = arith.constant 0 : index
    %c0_14 = arith.constant 0 : index
    %22 = vector.load %arg10[%c0_13, %c0_14] : memref<8x128xf32, #tpu.memory_space<vmem>>, vector<8x128xf32>
    %23 = vector.broadcast %12 : vector<8x1xf32> to vector<8x128xf32>
    %24 = arith.mulf %23, %22 : vector<8x128xf32>
    %c0_15 = arith.constant 0 : index
    %c0_16 = arith.constant 0 : index
    %c0_17 = arith.constant 0 : index
    %25 = vector.load %arg5[%c0_15, %c0_16, %c0_17] : memref<1x8x128xf32, #tpu.memory_space<vmem>>, vector<1x8x128xf32>
    %26 = vector.shape_cast %25 : vector<1x8x128xf32> to vector<8x128xf32>
    %cst_18 = arith.constant dense<0.000000e+00> : vector<8x128xf32>
    %27 = tpu.matmul %15, %26, %cst_18 {dimension_numbers = #tpu.dot_dimension_numbers<[1], [0], [0], [1], [0, 0, 1, 1], [], []>} : vector<8x8xf32>, vector<8x128xf32>, vector<8x128xf32> -> vector<8x128xf32>
    %28 = arith.addf %24, %27 : vector<8x128xf32>
    %c0_19 = arith.constant 0 : index
    %c0_20 = arith.constant 0 : index
    %29 = vector.load %arg10[%c0_19, %c0_20] : memref<8x128xf32, #tpu.memory_space<vmem>>, vector<8x128xf32>
    tpu.vector_store %arg10[%c0_19, %c0_20], %28 {strides = array<i32>} : memref<8x128xf32, #tpu.memory_space<vmem>>, vector<8x128xf32>,
    %c0_21 = arith.constant 0 : index
    %c0_22 = arith.constant 0 : index
    %30 = vector.load %arg8[%c0_21, %c0_22] : memref<8x1xf32, #tpu.memory_space<vmem>>, vector<8x1xf32>
    tpu.vector_store %arg8[%c0_21, %c0_22], %10 {strides = array<i32>} : memref<8x1xf32, #tpu.memory_space<vmem>>, vector<8x1xf32>,
    %c0_i32_23 = arith.constant 0 : i32
    %31 = arith.cmpi eq, %arg2, %c0_i32_23 : i32
    %32 = arith.extui %31 : i1 to i32
    %c0_i32_24 = arith.constant 0 : i32
    %33 = arith.cmpi ne, %32, %c0_i32_24 : i32
    scf.if %33 {
      %c0_25 = arith.constant 0 : index
      %c0_26 = arith.constant 0 : index
      %34 = vector.load %arg9[%c0_25, %c0_26] : memref<8x1xf32, #tpu.memory_space<vmem>>, vector<8x1xf32>
      %35 = tpu.reciprocal %34 {approx = true} : vector<8x1xf32> -> vector<8x1xf32>
      %36 = arith.mulf %34, %35 : vector<8x1xf32>
      %cst_27 = arith.constant 2.000000e+00 : f32
      %37 = vector.broadcast %cst_27 : f32 to vector<8x1xf32>
      %38 = arith.subf %37, %36 : vector<8x1xf32>
      %39 = arith.mulf %35, %38 : vector<8x1xf32>
      %40 = arith.mulf %34, %39 : vector<8x1xf32>
      %cst_28 = arith.constant 2.000000e+00 : f32
      %41 = vector.broadcast %cst_28 : f32 to vector<8x1xf32>
      %42 = arith.subf %41, %40 : vector<8x1xf32>
      %43 = arith.mulf %39, %42 : vector<8x1xf32>
      %c0_29 = arith.constant 0 : index
      %c0_30 = arith.constant 0 : index
      %44 = vector.load %arg10[%c0_29, %c0_30] : memref<8x128xf32, #tpu.memory_space<vmem>>, vector<8x128xf32>
      %45 = vector.broadcast %43 : vector<8x1xf32> to vector<8x128xf32>
      %46 = arith.mulf %44, %45 : vector<8x128xf32>
      %c0_31 = arith.constant 0 : index
      %c0_32 = arith.constant 0 : index
      %c0_33 = arith.constant 0 : index
      %47 = vector.load %arg6[%c0_31, %c0_32, %c0_33] : memref<1x8x128xf32, #tpu.memory_space<vmem>>, vector<1x8x128xf32>
      %48 = vector.shape_cast %47 : vector<1x8x128xf32> to vector<8x128xf32>
      %49 = vector.shape_cast %46 : vector<8x128xf32> to vector<1x8x128xf32>
      tpu.vector_store %arg6[%c0_31, %c0_32, %c0_33], %49 {strides = array<i32>} : memref<1x8x128xf32, #tpu.memory_space<vmem>>, vector<1x8x128xf32>,
    } else {
    }
    return
  }
  func.func @transform_0(%arg0: i32, %arg1: i32, %arg2: i32) -> (i32, i32, i32) {
    %c0_i32 = arith.constant 0 : i32
    %c0_i32_0 = arith.constant 0 : i32
    return %arg0, %arg1, %c0_i32 : i32, i32, i32
  }
  func.func @transform_1(%arg0: i32, %arg1: i32, %arg2: i32) -> (i32, i32, i32) {
    %c0_i32 = arith.constant 0 : i32
    %c0_i32_0 = arith.constant 0 : i32
    return %arg0, %arg2, %c0_i32 : i32, i32, i32
  }
  func.func @transform_2(%arg0: i32, %arg1: i32, %arg2: i32) -> (i32, i32, i32) {
    %c0_i32 = arith.constant 0 : i32
    %c0_i32_0 = arith.constant 0 : i32
    return %arg0, %arg2, %c0_i32 : i32, i32, i32
  }
  func.func @transform_3(%arg0: i32, %arg1: i32, %arg2: i32) -> (i32, i32, i32) {
    %c0_i32 = arith.constant 0 : i32
    %c0_i32_0 = arith.constant 0 : i32
    return %arg0, %arg1, %c0_i32 : i32, i32, i32
  }
}

</mosaic_0001>

<bundles_post_ra>
// kernel: tpu_custom_call.1
= control target key start
LH: loop header
LB: loop body
LE: loop exit
PB: predicated region body
PF: predicated region fallthrough
CT: control target
= control target key end

     0   :  { %s1236_s0 = inlined_call_operand.hbm [shape: f32[2,8,128], index: 0, kind: input, shape index: {}]   ;;  %s1237_s1 = inlined_call_operand.hbm [shape: f32[2,8,128], index: 1, kind: input, shape index: {}]   ;;  %s1238_s2 = inlined_call_operand.hbm [shape: f32[2,8,128], index: 2, kind: input, shape index: {}]   ;;  %s1239_s3 = inlined_call_operand.hbm [shape: f32[2,8,128], index: 3, kind: output, shape index: {}]  }
   0x1   :  { %1245 = sst [smem:[#allocation19_spill]] %s1237_s1 }
   0x2   :  { %8 = vsyncpa [#allocation7], 0 }
   0x3   :  { %10 = vsyncpa [#allocation7 + $0x1], 0 }
   0x4   :  { %11 = vsyncpa [#allocation10], 0 }
   0x5   :  { %13 = vsyncpa [#allocation10 + $0x1], 0 }
   0x6   :  { %14 = vsyncpa [#allocation8], 0 }
   0x7   :  { %16 = vsyncpa [#allocation8 + $0x1], 0  ;;  %s965_s12 = smov 0   ;;  %s967_s13 = smov 0  }
   0x8   :  { %s969_s14 = smov 0   ;;  %s971_s15 = smov 0  }
   0x9   :  { %s973_s16 = smov 0   ;;  %s975_s17 = smov 0  }
   0xa LB: > { %1246 = sst [smem:[#allocation16_spill]] %s931_s16  ;;  %s996_s18 = sadd.s32 4294967295, %s935_s17   ;;  %s935_s17 = sphi %s975_s17, %s22_s17   ;;  %s931_s16 = sphi %s973_s16, %s1267_s16   ;;  %s927_s15 = sphi %s971_s15, %s1266_s15   ;;  %s923_s14 = sphi %s969_s14, %s1270_s14   ;;  %s919_s13 = sphi %s967_s13, %s1269_s13   ;;  %s915_s12 = sphi %s965_s12, %s1268_s12  }
   0xb   : > { %s642_s19 = sadd.s32 4294967294, %s935_s17   ;;  %s41_s20 = sadd.s32 1, %s931_s16 }
   0xc   : > { %s50_s21 = sadd.s32 1, %s923_s14  ;;  %p43_p0 = scmp.ge.s32.totalorder %s41_s20, 2 }
   0xd   : > { %p57_p1 = scmp.ne.s32.totalorder %s923_s14, %s919_s13  ;;  %p58_p2 = scmp.eq.s32.totalorder %s935_s17, 0 }
   0xe   : > { %p63_p3 = scmp.ne.s32.totalorder %s919_s13, %s915_s12  ;;  %s1272_s20 = smov (%p43_p0, %s41_s20), 0 }
   0xf   : > { %1247 = sst [smem:[#allocation17_spill]] %s1272_s20  ;;  %p1008_p4 = por %p58_p2, %p57_p1 }
  0x10   : > { %p64_p5 = scmp.eq.s32.totalorder %s996_s18, 0  ;;  %s45_s23 = ssub.s32 %s931_s16, %s1272_s20 }
  0x11   : > { %p145_p6 = scmp.eq.s32.totalorder %s996_s18, 1  ;;  %p48_p7 = scmp.eq.s32.totalorder %s45_s23, 0 }
  0x12   : > { %p1016_p8 = por %p64_p5, %p63_p3  ;;  %p151_p10 = scmp.eq.s32.totalorder %s642_s19, 1 }
  0x13   : > { %p1020_p9 = por %p145_p6, %p57_p1  ;;  %p697_p13 = scmp.lt.s32.totalorder %s935_s17, 2 }
  0x14   : > { %s1249_s24 = scalar_select %p1016_p8, 1, 0 }
  0x15   : > { %s1250_s25 = scalar_select %p1020_p9, 1, 0 }
  0x16   : > { %s1025_s26 = scalar_select %p48_p7, %s923_s14, %s50_s21  }
  0x17   : > { %p1027_p11 = por %p151_p10, %p63_p3  ;;  %s171_s28 = sand.u32 1, %s923_s14  }
  0x18   : > { %1251 = sst [smem:[#allocation18_spill]] %s1025_s26  ;;  %s1036_s29 = sshll.u32 %s171_s28, 3 }
  0x19   : > { %s1252_s27 = scalar_select %p1027_p11, 1, 0 }
  0x1a   : > { %s1039_s30 = sshll.u32 %s931_s16, 7  ;;  %p1043_p0 = pnand %p697_p13, %p1008_p4 }
  0x1b   : > { %s190_s5 = sand.u32 1, %s935_s17   ;;  %s1254_s1 = sld [smem:[#allocation19_spill]] }
  0x1c   : > { %s1253_s4 = scalar_select %p1043_p0, 1, 0 }
  0x1d   : > { %s194_s9 = scalar_lea.vmem [#allocation9], %s1036_s29  ;;  %s1059_s11 = scalar_lea.sflag [#allocation10], %s190_s5 }
  0x1e   : > { %s202_s10 = sshll.u32 %s194_s9, 4  ;;  %p1065_p4 = pneg %p1043_p0  ;;  %s1056_s10 = int_to_ptr.vmem [resolvable:$true] %s202_s10 }
  0x21   : > { %s1052_s8 = scalar_lea.hbm %s1254_s1, %s1039_s30  ;;  %s764_s6 = scalar_lea.hbm %s1254_s1, 256 }
  0x22   : > { %s759_s19 = scalar_lea.hbm %s1052_s8, 128  ;;  %p765_p7 = scmp.lt.u32.totalorder %s1052_s8, %s1254_s1 }
  0x23   : > { %p760_p3 = scmp.ne.s32.totalorder %s1052_s8, %s759_s19  ;;  %p766_p10 = scmp.lt.u32.totalorder %s764_s6, %s759_s19 }
  0x24   : > { %p768_p12 = scmp.lt.u32.totalorder %s759_s19, %s1052_s8 }
  0x25   : > { %p762_p5 = pnand %p1065_p4, %p760_p3  ;;  %p767_p13 = por %p766_p10, %p765_p7 }
  0x27   : > { %p763_p6 = pneg %p762_p5  ;;  %p769_p1 = por %p768_p12, %p767_p13 }
  0x29   : > { %p770_p2 = pnand %p769_p1, %p763_p6 }
  0x2b   : > { %773 = shalt.err (!%p770_p2)
}
  0x2c   : > { %s774_s5 = scalar_lea.vmem %s1056_s10, 128  ;;  %s937_s22 = smov [#allocation9]  }
  0x2d   : > { %p775_p3 = scmp.ne.s32.totalorder %s1056_s10, %s774_s5  ;;  %s779_s23 = sshll.u32 %s937_s22, 4  ;;  %s780_s23 = int_to_ptr.vmem [resolvable:$false] %s779_s23 }
  0x2e   : > { %s781_s7 = scalar_lea.vmem %s780_s23, 256  ;;  %p782_p9 = scmp.lt.s32.totalorder %s1056_s10, %s780_s23 }
  0x2f   : > { %p777_p5 = pnand %p775_p3, %p1065_p4  ;;  %p783_p8 = scmp.lt.s32.totalorder %s781_s7, %s774_s5 }
  0x31   : > { %p778_p11 = pneg %p777_p5  ;;  %p784_p7 = por %p783_p8, %p782_p9 }
  0x33   : > { %p785_p10 = pnand %p784_p7, %p778_p11 }
  0x35   : > { %788 = shalt.err (!%p785_p10)
}
  0x36   : > { %689 = dma.hbm_to_vmem [thread:$0]  (!%p1043_p0), %s1052_s8, 128, %s1056_s10, %s1059_s11  }
  0x37   : > { %p1256_p12 = scmp.lt.s32.totalorder %s935_s17, 3  ;;  %p1257_p1 = scmp.ge.s32.totalorder %s935_s17, 1 }
  0x38   : > { %s1101_s5 = scalar_lea.hbm %s1236_s0, %s1039_s30  ;;  %s175_s22 = scalar_lea.vmem [#allocation6], %s1036_s29 }
  0x39   : > { %p1093_p2 = pnand %p1257_p1, %p1256_p12  ;;  %s183_s23 = sshll.u32 %s175_s22, 4  ;;  %s1104_s23 = int_to_ptr.vmem [resolvable:$true] %s183_s23 }
  0x3a   : > { %s1110_s7 = scalar_lea.hbm %s1238_s2, %s1039_s30  ;;  %s172_s1 = scalar_lea.sflag [#allocation7], %s171_s28 }
  0x3b   : > { %s1258_s19 = scalar_select %p1093_p2, 1, 0 }
  0x3c   : > { %s789_s20 = scalar_lea.hbm %s1101_s5, 128  ;;  %s794_s16 = scalar_lea.hbm %s1236_s0, 256 }
  0x3d   : > { %p790_p8 = scmp.ne.s32.totalorder %s1101_s5, %s789_s20  ;;  %p795_p6 = scmp.lt.u32.totalorder %s1101_s5, %s1236_s0 }
  0x3e   : > { %p796_p13 = scmp.lt.u32.totalorder %s794_s16, %s789_s20  ;;  %p798_p5 = scmp.lt.u32.totalorder %s789_s20, %s1101_s5 }
  0x3f   : > { %p792_p9 = pnand %p790_p8, %p1065_p4 }
  0x40   : > { %p797_p3 = por %p796_p13, %p795_p6 }
  0x41   : > { %p793_p11 = pneg %p792_p9 }
  0x42   : > { %p799_p7 = por %p798_p5, %p797_p3 }
  0x44   : > { %p800_p10 = pnand %p799_p7, %p793_p11 }
  0x46   : > { %803 = shalt.err (!%p800_p10)
}
  0x47   : > { %s804_s28 = scalar_lea.vmem %s1104_s23, 128  ;;  %s938_s30 = smov [#allocation6]  }
  0x48   : > { %p805_p12 = scmp.ne.s32.totalorder %s1104_s23, %s804_s28  ;;  %s809_s8 = sshll.u32 %s938_s30, 4  ;;  %s810_s8 = int_to_ptr.vmem [resolvable:$false] %s809_s8 }
  0x49   : > { %s811_s26 = scalar_lea.vmem %s810_s8, 256  ;;  %p812_p9 = scmp.lt.s32.totalorder %s1104_s23, %s810_s8 }
  0x4a   : > { %p807_p1 = pnand %p805_p12, %p1065_p4  ;;  %p813_p2 = scmp.lt.s32.totalorder %s811_s26, %s804_s28 }
  0x4c   : > { %p808_p8 = pneg %p807_p1  ;;  %p814_p6 = por %p813_p2, %p812_p9 }
  0x4e   : > { %p815_p13 = pnand %p814_p6, %p808_p8 }
  0x50   : > { %818 = shalt.err (!%p815_p13)
}
  0x51   : > { %686 = dma.hbm_to_vmem [thread:$0]  (!%p1043_p0), %s1101_s5, 128, %s1104_s23, %s172_s1  }
  0x52   : > { %s213_s16 = scalar_lea.vmem [#allocation11], %s1036_s29  ;;  %s819_s10 = scalar_lea.hbm %s1110_s7, 128 }
  0x53   : > { %s221_s20 = sshll.u32 %s213_s16, 4  ;;  %p820_p11 = scmp.ne.s32.totalorder %s1110_s7, %s819_s10  ;;  %s222_s20 = int_to_ptr.vmem [resolvable:$true] %s221_s20 }
  0x54   : > { %s824_s22 = scalar_lea.hbm %s1238_s2, 256  ;;  %p825_p5 = scmp.lt.u32.totalorder %s1110_s7, %s1238_s2 }
  0x55   : > { %p822_p2 = pnand %p820_p11, %p1065_p4  ;;  %p826_p7 = scmp.lt.u32.totalorder %s824_s22, %s819_s10 }
  0x56   : > { %p828_p12 = scmp.lt.u32.totalorder %s819_s10, %s1110_s7 }
  0x57   : > { %p823_p3 = pneg %p822_p2  ;;  %p827_p10 = por %p826_p7, %p825_p5 }
  0x59   : > { %p829_p1 = por %p828_p12, %p827_p10 }
  0x5b   : > { %p830_p8 = pnand %p829_p1, %p823_p3 }
  0x5d   : > { %833 = shalt.err (!%p830_p8)
}
  0x5e   : > { %s834_s1 = scalar_lea.vmem %s222_s20, 128  ;;  %s939_s29 = smov [#allocation11]  }
  0x5f   : > { %p835_p9 = scmp.ne.s32.totalorder %s222_s20, %s834_s1  ;;  %s839_s5 = sshll.u32 %s939_s29, 4  ;;  %s840_s5 = int_to_ptr.vmem [resolvable:$false] %s839_s5 }
  0x60   : > { %s841_s23 = scalar_lea.vmem %s840_s5, 256  ;;  %p842_p11 = scmp.lt.s32.totalorder %s222_s20, %s840_s5 }
  0x61   : > { %p837_p6 = pnand %p835_p9, %p1065_p4  ;;  %p843_p2 = scmp.lt.s32.totalorder %s841_s23, %s834_s1 }
  0x63   : > { %p838_p13 = pneg %p837_p6  ;;  %p844_p0 = por %p843_p2, %p842_p11 }
  0x65   : > { %p845_p5 = pnand %p844_p0, %p838_p13 }
  0x67   : > { %848 = shalt.err (!%p845_p5)
}
  0x68   : > { %p1259_p7 = scmp.ne.s32.totalorder %s1253_s4, 0  ;;  %p1260_p3 = scmp.ne.s32.totalorder %s1258_s19, 0 }
  0x69   : > { %s1157_s21 = sand.u32 (!%p1260_p3), 1, %s919_s13   ;;  %p1261_p0 = scmp.ne.s32.totalorder (!%p1260_p3), %s1249_s24, 0 }
  0x6a   : > { %692 = dma.hbm_to_vmem [thread:$0]  (!%p1259_p7), %s1110_s7, 128, %s222_s20, %s1059_s11  }
  0x6b   : > { %230 = sbr.rel (%p1260_p3) target bundleno = 944 (0x3b0), region = 32  ;;  %s1160_s8 = sshll.u32 (!%p1260_p3), %s1157_s21, 3 }
  0x6c   : > { %s233_s26 = scalar_lea.sflag (!%p1260_p3), [#allocation7], %s1157_s21  ;;  %s236_s16 = scalar_lea.vmem (!%p1260_p3), [#allocation6], %s1160_s8 }
  0x72   : > { %902 = dma.done.wait (%p1261_p0), %s233_s26, 128  }
  0x73   : > { %904 = vsyncadd (%p1261_p0), %s233_s26, 4294967168  ;;  %s241_s4 = sand.u32 1, %s996_s18   ;;  %s245_s19 = scalar_lea.vmem [#allocation9], %s1160_s8 }
  0x74   : > { %s242_s11 = scalar_lea.sflag [#allocation10], %s241_s4 }
  0x75   : > { %906 = dma.done.wait (%p1261_p0), %s242_s11, 256  }
  0x76   : > { %908 = vsyncadd (%p1261_p0), %s242_s11, 4294967040  ;;  %vm294_vm0 = vcmask 7168   ;;  %v940_v0 = vmov 0.0   ;;  %vm941_vm1 = vmmov 0   ;;  %v299_v1 = vld [vmem:[%s245_s19] sm:$0xff]  ;;  %v291_v2 = vld [vmem:[%s236_s16] sm:$0xff] }
  0x77   : > { %296 = vst.msk [vmem:[#allocation4] sm:$0xff] %vm294_vm0, %v940_v0  ;;  %665 = vmatprep.subr.mxu0 %v940_v0  ;;  %667 = vmatprep.mubr.msk.f32.mxu0 %vm941_vm1, %v940_v0  ;;  %v292_v3 = vmul.f32 0.17677669, %v291_v2  ;;  %v942_v4 = vmov -inf   ;;  %vm371_vm2 = vcmask 64512   ;;  %v943_v8 = vmov 0  }
  0x78   : > { %670 = vmatprep.subr.mxu1 %v940_v0  ;;  %672 = vmatprep.mubr.msk.f32.mxu1 %vm941_vm1, %v940_v0  ;;  %295 = vst.msk [vmem:[#allocation3] sm:$0xff] %vm294_vm0, %v942_v4  ;;  %s254_s18 = scalar_lea.vmem [#allocation11], %s1160_s8  ;;  %s658_s24 = sshll.u32 %s927_s15, 7 }
  0x79   : > { %666 = vmatpush3.xpose.msra.mxu0 %v299_v1  ;;  %751 = vset.pattern.permute.xlu0 %v943_v8  ;;  %v402_v13 = vld [vmem:[%s254_s18] sm:$0xff]  ;;  %s286_s7 = scalar_lea.vmem [#allocation12], %s1160_s8  ;;  %s1187_s9 = scalar_lea.hbm %s1239_s3, %s658_s24 }
  0x7a   : > { %752 = vset.pattern.permute.xlu1 %v943_v8  ;;  %671 = vmatpush3.msra.mxu1 %v402_v13  ;;  %s513_s20 = sshll.u32 %s286_s7, 4  ;;  %s499_s22 = scalar_lea.sflag [#allocation8], %s1157_s21  ;;  %s1189_s20 = int_to_ptr.vmem [resolvable:$true] %s513_s20 }
  0x7b   : > { %s849_s28 = scalar_lea.vmem %s1189_s20, 128  ;;  %p1262_p10 = scmp.ne.s32.totalorder %s1250_s25, 0 }
  0x7c   : > { %668 = vmatmul.mubr.f32.vlgmr.msra.gmra.mrb[0].mxu0 %v292_v3  ;;  %p850_p4 = scmp.ne.s32.totalorder %s1189_s20, %s849_s28  ;;  %s944_s15 = smov [#allocation12]  }
  0x7d   : > { %s853_s30 = sshll.u32 %s944_s15, 4  ;;  %s854_s30 = int_to_ptr.vmem [resolvable:$false] %s853_s30 }
  0x7e   : > { %v387_v21 = vld [vmem:[#allocation4] sm:$0xff]  ;;  %p851_p12 = pnand %p850_p4, %p1262_p10  ;;  %s855_s1 = scalar_lea.vmem %s854_s30, 256 }
  0x7f   : > { %v370_v9 = vld [vmem:[#allocation3] sm:$0xff]  ;;  %p856_p8 = scmp.lt.s32.totalorder %s1189_s20, %s854_s30  ;;  %p857_p9 = scmp.lt.s32.totalorder %s855_s1, %s849_s28 }
  0x80   : > { %p852_p1 = pneg %p851_p12 }
  0x81   : > { %p858_p6 = por %p857_p9, %p856_p8 }
  0x83   : > { %p859_p13 = pnand %p858_p6, %p852_p1 }
 0x14f   : > { %v366_v5 = vpop.f32.mrb[0].mxu0 }
 0x150   : > { %v669_v6 = vpop.f32.mrb[1].mxu0  ;;  %v372_v7 = vsel %vm371_vm2, %v366_v5, -inf }
 0x151   : > { %373 = vmax.xlane.f32.xlu0 %v372_v7 }
 0x1de   : > { %v374_v10 = vpop.xlane.xlu0 %373 }
 0x1df   : > { %v375_v11 = vmax.f32 %v370_v9, %v374_v10 }
 0x1e1   : > { %v376_v12 = vsub.f32 %v370_v9, %v375_v11  ;;  %478 = vst.msk [vmem:[#allocation3] sm:$0xff] %vm294_vm0, %v375_v11  ;;  %381 = vperm.xlu0 %751, %v375_v11  }
 0x1e3   : > { %v377_v19 = vmul.f32 1.442695, %v376_v12 }
 0x260   : > { %v382_v14 = vpop.permute.xlu0 %381 }
 0x261   : > { %v384_v15 = vsub.f32 %v366_v5, %v382_v14 }
 0x263   : > { %v385_v16 = vmul.f32 1.442695, %v384_v15 }
 0x265   : > { %753 = vpow2.f32 %v385_v16 }
 0x266   : > { %755 = vpow2.f32 %v377_v19 }
 0x26f   : > { %v754_v17 = vpop.eup %753 }
 0x270   : > { %673 = vmatmul.mubr.msk.f32.vlgmr.msra.gmra.mrb[0].mxu1 %vm371_vm2, %v754_v17  ;;  %v389_v18 = vsel %vm371_vm2, %v754_v17, 0.0  ;;  %v756_v20 = vpop.eup %755 }
 0x271   : > { %390 = vadd.xlane.f32.xlu1 %v389_v18  ;;  %v388_v22 = vmul.f32 %v756_v20, %v387_v21 }
 0x282   : > { %398 = vperm.xlu1 %752, %v756_v20  }
 0x2fe   : > { %v391_v23 = vpop.xlane.xlu1 %390 }
 0x2ff   : > { %v392_v24 = vadd.f32 %v391_v23, %v388_v22 }
 0x301   : > { %394 = vst.msk [vmem:[#allocation4] sm:$0xff] %vm294_vm0, %v392_v24 }
 0x302   : > { %v399_v35 = vpop.permute.xlu1 %398 }
 0x303   : > { %v401_v36 = vmul.f32 0.0, %v399_v35 }
 0x308   : > { %v482_v25 = vld [vmem:[#allocation4] sm:$0xff] }
 0x309   : > { %757 = vrcp.f32 %v482_v25 }
 0x313   : > { %v758_v26 = vpop.eup %757 }
 0x314   : > { %v484_v27 = vmul.f32 %v758_v26, %v482_v25 }
 0x316   : > { %v485_v28 = vsub.f32 2.0, %v484_v27 }
 0x318   : > { %v486_v29 = vmul.f32 %v758_v26, %v485_v28 }
 0x31a   : > { %v487_v30 = vmul.f32 %v486_v29, %v482_v25 }
 0x31c   : > { %v488_v31 = vsub.f32 2.0, %v487_v30 }
 0x31e   : > { %v489_v32 = vmul.f32 %v488_v31, %v486_v29 }
 0x320   : > { %493 = vperm.xlu1 %752, %v489_v32  }
 0x343   : > { %v472_v33 = vpop.f32.mrb[0].mxu1 }
 0x344   : > { %v674_v34 = vpop.f32.mrb[1].mxu1  ;;  %v476_v37 = vadd.f32 %v472_v33, %v401_v36 }
 0x39f   : > { %v494_v38 = vpop.permute.xlu1 %493 }
 0x3a0   : > { %v496_v39 = vmul.f32 %v494_v38, %v476_v37 }
 0x3a2   : > { %497 = vst [vmem:[%s286_s7] sm:$0xff] %v496_v39 }
 0x3a3   : > { %862 = shalt.err (!%p859_p13)
}
 0x3a4   : > { %s863_s29 = scalar_lea.hbm %s1187_s9, 128  ;;  %s867_s21 = scalar_lea.hbm %s1239_s3, 256 }
 0x3a5   : > { %p864_p11 = scmp.ne.s32.totalorder %s1187_s9, %s863_s29  ;;  %p868_p7 = scmp.lt.u32.totalorder %s1187_s9, %s1239_s3 }
 0x3a6   : > { %p869_p3 = scmp.lt.u32.totalorder %s867_s21, %s863_s29  ;;  %p871_p4 = scmp.lt.u32.totalorder %s863_s29, %s1187_s9 }
 0x3a7   : > { %p865_p2 = pnand %p864_p11, %p1262_p10 }
 0x3a8   : > { %p870_p0 = por %p869_p3, %p868_p7 }
 0x3a9   : > { %p866_p5 = pneg %p865_p2 }
 0x3aa   : > { %p872_p12 = por %p871_p4, %p870_p0 }
 0x3ac   : > { %p873_p1 = pnand %p872_p12, %p866_p5 }
 0x3ae   : > { %876 = shalt.err (!%p873_p1)
}
 0x3af   : > { %681 = dma.vmem_to_hbm [thread:$0]  (%p1262_p10), %s1189_s20, 128, %s1187_s9, %s499_s22  }
 0x3b0 PF: > { %s525_s16 = sand.u32 1, %s915_s12   ;;  %p1263_p8 = scmp.ne.s32.totalorder %s1252_s27, 0 }
 0x3b1   : > { %p1264_p9 = scmp.ge.s32.totalorder %s935_s17, 2  ;;  %s526_s4 = scalar_lea.sflag [#allocation8], %s525_s16 }
 0x3b3   : > { %p694_p6 = pnand %p1264_p9, %p1263_p8 }
 0x3b5   : > { %910 = dma.done.wait (!%p694_p6), %s526_s4, 128  }
 0x3b6   : > { %912 = vsyncadd (!%p694_p6), %s526_s4, 4294967168  ;;  %s22_s17 = sadd.s32 1, %s935_s17   ;;  %s1265_s25 = sld [smem:[#allocation18_spill]] }
 0x3b7   : > { %p19_p13 = scmp.ge.s32.totalorder %s22_s17, 4   ;;  %s1266_s15 = sld [smem:[#allocation16_spill]] }
 0x3b8   : > { %s1267_s16 = sld [smem:[#allocation17_spill]]  ;;  %s1268_s12 = smov %s919_s13 }
 0x3b9   : > { %s1269_s13 = smov %s923_s14  ;;  %21 = sbr.rel (!%p19_p13) target bundleno = 10 (0xa), region = 109 }
 0x3bc   : > { %s1270_s14 = smov %s1265_s25 }
 0x3c0   :  { %531 = vsyncpa [#allocation7], 1 }
 0x3c1   :  { %533 = vsyncpa [#allocation7 + $0x1], 1 }
 0x3c2   :  { %534 = vsyncpa [#allocation10], 1 }
 0x3c3   :  { %536 = vsyncpa [#allocation10 + $0x1], 1 }
 0x3c4   :  { %537 = vsyncpa [#allocation8], 1 }
 0x3c5   :  { %539 = vsyncpa [#allocation8 + $0x1], 1 }

</bundles_post_ra>
